<compile_context>
chip_gen: v5e
topology: v5e:2x2
jax: 0.10.0
libtpu: 0.0.40
codegen_flags: <defaults>
</compile_context>

<pallas_src>
import jax
import jax.numpy as jnp
import numpy as np
from jax.experimental import pallas as pl
from jax.experimental.pallas import tpu as pltpu


def fused_kernel(x_ref, w_ref, b_ref, o_ref):
    """x_ref/o_ref: (nb, C, tile_m); w_ref: (C, C); b_ref: (C, 1)."""
    w = w_ref[...]
    b = b_ref[...]          # already contains W2@b1 + b2 + 4
    nb = x_ref.shape[0]
    for i in range(nb):     # static unroll over the small batch block (nb <= 8)
        x = x_ref[i]        # (C, tile_m): channels on sublanes, spatial on lanes
        # folded 1x1 convs (exact f32).  If a bundle dump shows the tiny C=10
        # MXU dot is the binding slot, a 10-term VPU channel mix is an exact
        # drop-in; left on the MXU since the kernel is HBM-bound.
        y = jnp.dot(w, x, preferred_element_type=jnp.float32)
        # (v2 + 4 + 2*x) * x  ==  original v8 * x
        o_ref[i] = (y + b + 2.0 * x) * x


def _tensorcores_per_chip():
    # v7x has 2 TensorCores per chip; v5e/v6e have 1.  Be defensive.
    try:
        kind = jax.devices()[0].device_kind.lower()
        return 2 if "v7" in kind else 1
    except Exception:
        return 1


_MAX_LANES = 32768  # (16, 32768)-padded f32 tile = 2 MiB -> fine on v7x's 64 MiB VMEM


def _pick_tiling(N, M, C, n_tc):
    # Lane (spatial) tile: full extent if it fits (always a legal block shape),
    # else a large multiple of 128; partial last block handled by Pallas.
    tile_m = M if M <= _MAX_LANES else _MAX_LANES

    # Batch blocking: group batches so one x block is ~2 MiB (cap the static
    # unroll at 8).  Only kicks in for the small-spatial / large-batch regime.
    slab_bytes = C * tile_m * 4
    nb = int(min(N, 8, max(1, (2 * 1024 * 1024) // max(slab_bytes, 1))))

    # Keep enough grid steps: v7x shards "parallel" axes across 2 TCs; single-TC
    # chips only need a couple of steps for pipeline overlap.
    min_steps = 8 if n_tc >= 2 else 2

    def steps(nb_, tm_):
        return pl.cdiv(N, nb_) * pl.cdiv(M, tm_)

    while nb > 1 and steps(nb, tile_m) < min_steps:
        nb = max(1, nb // 2)
    while (steps(nb, tile_m) < min_steps and tile_m > 1024
           and tile_m % 256 == 0):
        tile_m //= 2
    return nb, tile_m


def model_forward(x_nchw, w1, b1, w2, b2):
    N, C, H, W = x_nchw.shape
    M = H * W

    # Fold conv2(conv1(x)) = (W2@W1) x + (W2@b1 + b2); fold the "+4" constant.
    w_eff = jnp.dot(w2, w1)
    b_const = (jnp.dot(w2, b1) + b2 + 4.0).reshape(C, 1)

    nb, tile_m = _pick_tiling(N, M, C, _tensorcores_per_chip())
    grid = (pl.cdiv(N, nb), pl.cdiv(M, tile_m))

    # (N, C, H, W) -> (N, C, H*W): free reshape, no HBM transpose, no pad.
    x_mat = x_nchw.reshape(N, C, M)

    out_mat = pl.pallas_call(
        fused_kernel,
        out_shape=jax.ShapeDtypeStruct((N, C, M), jnp.float32),
        grid_spec=pltpu.PrefetchScalarGridSpec(
            num_scalar_prefetch=0,
            grid=grid,
            in_specs=[
                pl.BlockSpec((nb, C, tile_m), lambda n, i: (n, 0, i)),  # x
                pl.BlockSpec((C, C), lambda n, i: (0, 0)),              # W_eff
                pl.BlockSpec((C, 1), lambda n, i: (0, 0)),              # b_eff + 4
            ],
            out_specs=pl.BlockSpec((nb, C, tile_m), lambda n, i: (n, 0, i)),
        ),
        compiler_params=pltpu.CompilerParams(
            dimension_semantics=("parallel", "parallel"),
            vmem_limit_bytes=48 * 1024 * 1024,  # headroom under v7x's 64 MiB VMEM
        ),
    )(x_mat, w_eff, b_const)

    return out_mat.reshape(N, C, H, W)


def reference_forward(x, w1, b1, w2, b2):
    # pure-JAX reference (1x1 conv == einsum over channels)
    v1 = jnp.einsum("oc,nchw->nohw", w1, x) + b1[None, :, None, None]
    v2 = jnp.einsum("oc,nchw->nohw", w2, v1) + b2[None, :, None, None]
    v3 = 1 + x
    v4 = 1 + v3
    v5 = v2 + v4
    v6 = 1 + x
    v7 = v5 + v6
    v8 = 1 + v7
    return v8 * x


if __name__ == "__main__":
    key = jax.random.PRNGKey(0)
    kx, k1, k2, k3, k4, kx2, kx3 = jax.random.split(key, 7)

    # channels fixed at 10 by the module
    N, C, H, W = 2, 10, 16, 16
    x = jax.random.normal(kx, (N, C, H, W), dtype=jnp.float32)

    # deterministic Conv2d-style init (uniform in +-1/sqrt(fan_in))
    bound = 1.0 / np.sqrt(C)
    w1 = jax.random.uniform(k1, (C, C), jnp.float32, -bound, bound)
    b1 = jax.random.uniform(k2, (C,), jnp.float32, -bound, bound)
    w2 = jax.random.uniform(k3, (C, C), jnp.float32, -bound, bound)
    b2 = jax.random.uniform(k4, (C,), jnp.float32, -bound, bound)

    out = jax.block_until_ready(model_forward(x, w1, b1, w2, b2))
    ref = reference_forward(x, w1, b1, w2, b2)
    np.testing.assert_allclose(np.asarray(out), np.asarray(ref),
                               rtol=1e-5, atol=1e-5)

    # non-128-multiple spatial shape exercises the partial-last-block path
    x_odd = jax.random.normal(kx2, (1, C, 7, 9), dtype=jnp.float32)
    out_odd = jax.block_until_ready(model_forward(x_odd, w1, b1, w2, b2))
    ref_odd = reference_forward(x_odd, w1, b1, w2, b2)
    np.testing.assert_allclose(np.asarray(out_odd), np.asarray(ref_odd),
                               rtol=1e-5, atol=1e-5)

    # the module's nominal shape (1, 10, 64, 64)
    x_spec = jax.random.normal(kx3, (1, C, 64, 64), dtype=jnp.float32)
    out_spec = jax.block_until_ready(model_forward(x_spec, w1, b1, w2, b2))
    ref_spec = reference_forward(x_spec, w1, b1, w2, b2)
    np.testing.assert_allclose(np.asarray(out_spec), np.asarray(ref_spec),
                               rtol=1e-5, atol=1e-5)

    print("KERNEL_OK")
</pallas_src>

<mosaic_0001>
module attributes {stable_mosaic.version = 11 : i64} {
  func.func @fused_kernel(%arg0: i32, %arg1: i32, %arg2: memref<1x10x256xf32, #tpu.memory_space<vmem>>, %arg3: memref<10x10xf32, #tpu.memory_space<vmem>>, %arg4: memref<10x1xf32, #tpu.memory_space<vmem>>, %arg5: memref<1x10x256xf32, #tpu.memory_space<vmem>>) attributes {dimension_semantics = [#tpu.dimension_semantics<parallel>, #tpu.dimension_semantics<parallel>], iteration_bounds = array<i64: 2, 1>, scalar_prefetch = 0 : i64, scratch_operands = 0 : i64, tpu.core_type = #tpu.core_type<tc>, window_params = [{transform_indices = @transform_0, window_bounds = array<i64: 1, 10, 256>}, {pipeline_mode = #tpu.pipeline_mode<synchronous>, transform_indices = @transform_1, window_bounds = array<i64: 10, 10>}, {pipeline_mode = #tpu.pipeline_mode<synchronous>, transform_indices = @transform_2, window_bounds = array<i64: 10, 1>}, {transform_indices = @transform_3, window_bounds = array<i64: 1, 10, 256>}]} {
    %c0 = arith.constant 0 : index
    %c0_0 = arith.constant 0 : index
    %0 = vector.load %arg3[%c0, %c0_0] : memref<10x10xf32, #tpu.memory_space<vmem>>, vector<10x10xf32>
    %c0_1 = arith.constant 0 : index
    %c0_2 = arith.constant 0 : index
    %1 = vector.load %arg4[%c0_1, %c0_2] : memref<10x1xf32, #tpu.memory_space<vmem>>, vector<10x1xf32>
    %c0_3 = arith.constant 0 : index
    %c0_4 = arith.constant 0 : index
    %c0_5 = arith.constant 0 : index
    %2 = vector.load %arg2[%c0_3, %c0_4, %c0_5] : memref<1x10x256xf32, #tpu.memory_space<vmem>>, vector<1x10x256xf32>
    %3 = vector.shape_cast %2 : vector<1x10x256xf32> to vector<10x256xf32>
    %cst = arith.constant dense<0.000000e+00> : vector<10x256xf32>
    %4 = tpu.matmul %0, %3, %cst {dimension_numbers = #tpu.dot_dimension_numbers<[1], [0], [0], [1], [0, 0, 1, 1], [], []>} : vector<10x10xf32>, vector<10x256xf32>, vector<10x256xf32> -> vector<10x256xf32>
    %5 = vector.broadcast %1 : vector<10x1xf32> to vector<10x256xf32>
    %6 = arith.addf %4, %5 : vector<10x256xf32>
    %cst_6 = arith.constant 2.000000e+00 : f32
    %7 = vector.broadcast %cst_6 : f32 to vector<10x256xf32>
    %8 = arith.mulf %7, %3 : vector<10x256xf32>
    %9 = arith.addf %6, %8 : vector<10x256xf32>
    %10 = arith.mulf %9, %3 : vector<10x256xf32>
    %c0_7 = arith.constant 0 : index
    %c0_8 = arith.constant 0 : index
    %c0_9 = arith.constant 0 : index
    %11 = vector.load %arg5[%c0_7, %c0_8, %c0_9] : memref<1x10x256xf32, #tpu.memory_space<vmem>>, vector<1x10x256xf32>
    %12 = vector.shape_cast %11 : vector<1x10x256xf32> to vector<10x256xf32>
    %13 = vector.shape_cast %10 : vector<10x256xf32> to vector<1x10x256xf32>
    tpu.vector_store %arg5[%c0_7, %c0_8, %c0_9], %13 {strides = array<i32>} : memref<1x10x256xf32, #tpu.memory_space<vmem>>, vector<1x10x256xf32>,
    return
  }
  func.func @transform_0(%arg0: i32, %arg1: i32) -> (i32, i32, i32) {
    %c0_i32 = arith.constant 0 : i32
    %c0_i32_0 = arith.constant 0 : i32
    return %arg0, %c0_i32, %arg1 : i32, i32, i32
  }
  func.func @transform_1(%arg0: i32, %arg1: i32) -> (i32, i32) {
    %c0_i32 = arith.constant 0 : i32
    %c0_i32_0 = arith.constant 0 : i32
    %c0_i32_1 = arith.constant 0 : i32
    return %c0_i32, %c0_i32_0 : i32, i32
  }
  func.func @transform_2(%arg0: i32, %arg1: i32) -> (i32, i32) {
    %c0_i32 = arith.constant 0 : i32
    %c0_i32_0 = arith.constant 0 : i32
    %c0_i32_1 = arith.constant 0 : i32
    return %c0_i32, %c0_i32_0 : i32, i32
  }
  func.func @transform_3(%arg0: i32, %arg1: i32) -> (i32, i32, i32) {
    %c0_i32 = arith.constant 0 : i32
    %c0_i32_0 = arith.constant 0 : i32
    return %arg0, %c0_i32, %arg1 : i32, i32, i32
  }
}

</mosaic_0001>

<bundles_post_ra>
// kernel: tpu_custom_call.1
= control target key start
LH: loop header
LB: loop body
LE: loop exit
PB: predicated region body
PF: predicated region fallthrough
CT: control target
= control target key end

     0   :  { %s485_s12 = smov 0   ;;  %s487_s13 = smov 0   ;;  %s537_s0 = inlined_call_operand.vmem [shape: f32[2,10,256], index: 0, kind: input, shape index: {}]   ;;  %s538_s1 = inlined_call_operand.vmem [shape: f32[10,10], index: 1, kind: input, shape index: {}]   ;;  %s539_s2 = inlined_call_operand.vmem [shape: f32[10,1], index: 2, kind: input, shape index: {}]   ;;  %s540_s3 = inlined_call_operand.vmem [shape: f32[2,10,256], index: 3, kind: output, shape index: {}]  }
   0x1   :  { %s489_s14 = smov 0  }
   0x2 LB: > { %s25_s15 = sadd.s32 1, %s458_s13  ;;  %p395_p0 = scmp.ge.s32.totalorder %s462_s14, 1  ;;  %s462_s14 = sphi %s489_s14, %s13_s14   ;;  %s458_s13 = sphi %s487_s13, %s542_s13   ;;  %s454_s12 = sphi %s485_s12, %s541_s12  }
   0x3   : > { %p27_p1 = scmp.ge.s32.totalorder %s25_s15, 2  ;;  %p158_p2 = scmp.lt.s32.totalorder %s462_s14, 3 }
   0x5   : > { %s544_s15 = smov (%p27_p1, %s25_s15), 0  ;;  %p159_p3 = pnand %p395_p0, %p158_p2 }
   0x6   : > { %p191_p4 = scmp.lt.s32.totalorder (!%p159_p3), %s454_s12, 1 }
   0x7   : > { %162 = sbr.rel (%p159_p3) target bundleno = 160 (0xa0), region = 32 }
   0xc   : > { %v212_v0 = vld [vmem:[%s539_s2] sm:$0xff]  ;;  %v464_v1 = vmov 0   ;;  %s546_s12 = smov (!%p191_p4, %s454_s12), 1  ;;  %vm235_vm0 = vcmask 1041408   ;;  %vm228_vm1 = vcmask 80896  }
   0xd   : > { %439 = vset.pattern.permute.xlu0 %v464_v1  ;;  %s408_s18 = sshll.u32 %s546_s12, 5  ;;  %v210_v6 = vld [vmem:[%s538_s1] sm:$0xff]  ;;  %v211_v7 = vld [vmem:[%s538_s1 + $0x8] sm:$0x3] }
   0xe   : > { %220 = vperm.xlu0 %439, %v212_v0   ;;  %s198_s21 = scalar_lea.vmem %s537_s0, %s408_s18  ;;  %v213_v8 = vld [vmem:[%s539_s2 + $0x8] sm:$0x3]  ;;  %s208_s30 = scalar_lea.vmem %s540_s3, %s408_s18 }
   0xf   : > { %v216_v2 = vld [vmem:[%s198_s21 + $0x10] sm:$0x3]  ;;  %v217_v3 = vld [vmem:[%s198_s21 + $0x18] sm:$0x3]  ;;  %v214_v4 = vld [vmem:[%s198_s21] sm:$0xff] }
  0x10   : > { %400 = vmatpush.msk.msra.mxu0 %vm235_vm0, %v216_v2  ;;  %410 = vmatpush.msk.msra.mxu2 %vm235_vm0, %v216_v2  ;;  %v215_v5 = vld [vmem:[%s198_s21 + $0x8] sm:$0xff]  ;;  %v288_v10 = vmul.f32 2.0, %v214_v4  ;;  %v290_v19 = vmul.f32 2.0, %v216_v2  ;;  %v291_v23 = vmul.f32 2.0, %v217_v3 }
  0x11   : > { %403 = vmatpush.msk.msra.mxu1 %vm235_vm0, %v217_v3  ;;  %412 = vmatpush.msk.msra.mxu3 %vm235_vm0, %v217_v3  ;;  %v289_v12 = vmul.f32 2.0, %v215_v5 }
  0x12   : > { %257 = vmatpush.msra.mxu0 %v214_v4  ;;  %411 = vmatpush.msra.mxu2 %v214_v4 }
  0x13   : > { %280 = vmatpush.msra.mxu1 %v215_v5  ;;  %413 = vmatpush.msra.mxu3 %v215_v5 }
  0x14   : > { %401 = vmatmul.msk.f32.vlgmr.msra.gmra.mxu0 %vm228_vm1, %v210_v6  ;;  %402 = vmatmul.msk.f32.vlgmr.msra.gmra.mxu2 %vm228_vm1, %v211_v7 }
  0x15   : > { %404 = vmatmul.msk.f32.vlgmr.msra.gmra.mxu1 %vm228_vm1, %v210_v6  ;;  %405 = vmatmul.msk.f32.vlgmr.msra.gmra.mxu3 %vm228_vm1, %v211_v7 }
  0x16   : > { %225 = vperm.xlu0 %439, %v213_v8  }
  0x80   : > { %v221_v9 = vpop.permute.xlu0 %220 }
  0x88   : > { %v226_v20 = vpop.permute.xlu0 %225 }
  0x91   : > { %v259_v11 = vpop.f32.mrf.mxu0 }
  0x92   : > { %v260_v13 = vadd.f32 %v259_v11, %v221_v9  ;;  %v282_v14 = vpop.f32.mrf.mxu1 }
  0x93   : > { %v283_v15 = vadd.f32 %v282_v14, %v221_v9 }
  0x94   : > { %v292_v16 = vadd.f32 %v288_v10, %v260_v13 }
  0x95   : > { %v293_v17 = vadd.f32 %v289_v12, %v283_v15 }
  0x96   : > { %v296_v18 = vmul.f32 %v292_v16, %v214_v4 }
  0x97   : > { %v297_v21 = vmul.f32 %v293_v17, %v215_v5  ;;  %v262_v22 = vpop.f32.mrf.mxu2 }
  0x98   : > { %300 = vst [vmem:[%s208_s30] sm:$0xff] %v296_v18  ;;  %v263_v24 = vadd.f32 %v262_v22, %v226_v20  ;;  %v285_v25 = vpop.f32.mrf.mxu3 }
  0x99   : > { %301 = vst [vmem:[%s208_s30 + $0x8] sm:$0xff] %v297_v21  ;;  %v286_v26 = vadd.f32 %v285_v25, %v226_v20 }
  0x9a   : > { %v294_v27 = vadd.f32 %v290_v19, %v263_v24 }
  0x9b   : > { %v295_v28 = vadd.f32 %v291_v23, %v286_v26 }
  0x9c   : > { %v298_v29 = vmul.f32 %v294_v27, %v216_v2 }
  0x9d   : > { %v299_v30 = vmul.f32 %v295_v28, %v217_v3 }
  0x9e   : > { %302 = vst [vmem:[%s208_s30 + $0x10] sm:$0x3] %v298_v29 }
  0x9f   : > { %303 = vst [vmem:[%s208_s30 + $0x18] sm:$0x3] %v299_v30 }
  0xa0 PF: > { %s13_s14 = sadd.s32 1, %s462_s14   ;;  %s541_s12 = smov %s458_s13 }
  0xa1   : > { %p10_p5 = scmp.ge.s32.totalorder %s13_s14, 4   ;;  %s542_s13 = smov %s544_s15 }
  0xa3   :  { %12 = sbr.rel (!%p10_p5) target bundleno = 2 (0x2), region = 62 }

</bundles_post_ra>
